<compile_context>
chip_gen: v7x
topology: tpu7x:2x2x1
jax: 0.10.0
libtpu: 0.0.40
codegen_flags: <defaults>
</compile_context>

<pallas_src>
import functools

import jax
import jax.numpy as jnp
from jax.experimental import pallas as pl
from jax.experimental.pallas import tpu as pltpu

LANE = 128      # lane-dense width used for hidden features / weight slabs
SUBLANE = 8     # f32 sublane granularity for the batch axis


def _round_up(x, m):
    return (x + m - 1) // m * m


def qnet_kernel(x_ref, w_ref, b_ref, out_ref, *, state_dim, action_dim):
    """Fused 5-layer MLP: h = relu(h @ W_i + b_i) for i < L-1, then h @ W_{L-1} + b.

    x_ref  : (TB, state_dim)   f32  raw states (batch-padded only, compact lanes)
    w_ref  : (L, LANE, LANE)   bf16 zero-padded weight slabs, laid out (in, out)
    b_ref  : (L, LANE)         f32  zero-padded biases
    out_ref: (TB, action_dim)  f32  compact Q-values
    """
    num_layers = w_ref.shape[0]

    # Layer 0: contract the compact (TB, state_dim) states against only the
    # real input rows of the padded slab -> no 128-lane padded input in HBM.
    w0 = w_ref[0][:state_dim, :]                               # (state_dim, LANE) bf16
    h = jnp.dot(x_ref[...].astype(jnp.bfloat16), w0,
                preferred_element_type=jnp.float32)            # MXU, f32 accumulate
    h = jnp.maximum(h + b_ref[0], 0.0)                         # VPU bias + ReLU (f32)

    for layer in range(1, num_layers - 1):                     # static unroll
        h = jnp.dot(h.astype(jnp.bfloat16), w_ref[layer],
                    preferred_element_type=jnp.float32)
        h = jnp.maximum(h + b_ref[layer], 0.0)

    h = jnp.dot(h.astype(jnp.bfloat16), w_ref[num_layers - 1],
                preferred_element_type=jnp.float32) + b_ref[num_layers - 1]

    # Compact writeback: only the real action columns leave the kernel.
    out_ref[...] = h[:, :action_dim].astype(out_ref.dtype)


def pack_params(params):
    """Pack [(W, b)] with W:(in,out), b:(1,out) into lane-dense stacked slabs.

    Returns (w_packed: (L,128,128) bf16, b_packed: (L,128) f32), zero-padded.
    Zero padding is exact: padded input columns hit zero weight rows, padded
    output columns get zero weights + zero bias, and ReLU preserves zeros.
    Call this ONCE per parameter update, not per forward call.
    """
    n_layers = len(params)
    w_packed = jnp.zeros((n_layers, LANE, LANE), jnp.float32)
    b_packed = jnp.zeros((n_layers, LANE), jnp.float32)
    for i, (w, b) in enumerate(params):
        fin, fout = w.shape
        w_packed = w_packed.at[i, :fin, :fout].set(w)
        b_packed = b_packed.at[i, :fout].set(jnp.reshape(b, (-1,)))
    return w_packed.astype(jnp.bfloat16), b_packed


def _select_batch_tiling(batch, max_tile):
    """Pick (tile_rows, padded_batch).

    Keeps tiles <= max_tile, avoids a last tile that is mostly padding, and
    gives the grid >= 2 steps whenever the batch can be split, so the
    "parallel" batch axis shards across both TensorCores on v7x.
    """
    b8 = _round_up(max(batch, 1), SUBLANE)
    n_tiles = pl.cdiv(b8, max_tile)
    if b8 >= 2 * SUBLANE:            # enough rows to be worth splitting
        n_tiles = max(n_tiles, 2)
    tile = _round_up(pl.cdiv(b8, n_tiles), SUBLANE)
    n_tiles = pl.cdiv(b8, tile)
    return tile, tile * n_tiles


@functools.partial(
    jax.jit, static_argnames=("state_dim", "action_dim", "max_batch_tile"))
def qnetwork_forward(x, w_packed, b_packed, *, state_dim, action_dim,
                     max_batch_tile=1024):
    """x: (B, state_dim) f32; w_packed/b_packed from pack_params (done once)."""
    batch = x.shape[0]
    assert x.shape[1] == state_dim
    num_layers = w_packed.shape[0]

    tb, b_pad = _select_batch_tiling(batch, max_batch_tile)
    if b_pad != batch:
        x = jnp.pad(x, ((0, b_pad - batch), (0, 0)))   # fuses under jit

    out = pl.pallas_call(
        functools.partial(qnet_kernel, state_dim=state_dim,
                          action_dim=action_dim),
        out_shape=jax.ShapeDtypeStruct((b_pad, action_dim), jnp.float32),
        grid=(b_pad // tb,),
        in_specs=[
            # Compact activations, auto double-buffered over the batch grid.
            pl.BlockSpec((tb, state_dim), lambda i: (i, 0)),
            # Weights / biases: constant index_map -> VMEM-resident across tiles.
            pl.BlockSpec((num_layers, LANE, LANE), lambda i: (0, 0, 0)),
            pl.BlockSpec((num_layers, LANE), lambda i: (0, 0)),
        ],
        out_specs=pl.BlockSpec((tb, action_dim), lambda i: (i, 0)),
        compiler_params=pltpu.CompilerParams(
            dimension_semantics=("parallel",)),   # megacore sharding on v7x
    )(x, w_packed, b_packed)

    return out[:batch]


def init_linear(key, in_features, out_features):
    """Deterministic init mimicking torch.nn.Linear (uniform +-1/sqrt(fan_in))."""
    kw, kb = jax.random.split(key)
    bound = 1.0 / jnp.sqrt(jnp.float32(in_features))
    # Stored as (in, out) so the kernel computes x @ W (== torch x @ W_t.T).
    w = jax.random.uniform(kw, (in_features, out_features), jnp.float32,
                           minval=-bound, maxval=bound)
    b = jax.random.uniform(kb, (1, out_features), jnp.float32,
                           minval=-bound, maxval=bound)
    return w, b


def reference_forward(x, params, dtype=jnp.float32):
    """Pure-JAX reference.  dtype controls matmul operand precision."""
    h = x
    for i, (w, b) in enumerate(params):
        h = jnp.dot(h.astype(dtype), w.astype(dtype),
                    preferred_element_type=jnp.float32) + jnp.reshape(b, (1, -1))
        if i < len(params) - 1:
            h = jnp.maximum(h, 0.0)
    return h


if __name__ == "__main__":
    state_dim, hidden_size, action_dim = 8, 32, 4
    batch = 2

    key = jax.random.PRNGKey(0)
    k_x, k1, k2, k3, k4, k5 = jax.random.split(key, 6)

    params = [
        init_linear(k1, state_dim, hidden_size),
        init_linear(k2, hidden_size, hidden_size),
        init_linear(k3, hidden_size, hidden_size),
        init_linear(k4, hidden_size, hidden_size),
        init_linear(k5, hidden_size, action_dim),
    ]

    x = jax.random.normal(k_x, (batch, state_dim), jnp.float32)

    # Pack / cast weights ONCE (not per forward call).
    w_packed, b_packed = pack_params(params)

    out = jax.block_until_ready(
        qnetwork_forward(x, w_packed, b_packed,
                         state_dim=state_dim, action_dim=action_dim))
    assert out.shape == (batch, action_dim)

    # Tight check vs. a bf16-operand / f32-accumulate reference (same math).
    ref_bf16 = reference_forward(x, params, jnp.bfloat16)
    assert jnp.allclose(out, ref_bf16, atol=1e-4, rtol=1e-4), (
        jnp.max(jnp.abs(out - ref_bf16)))
    # Loose check vs. the float32 (PyTorch-semantics) reference.
    ref_f32 = reference_forward(x, params, jnp.float32)
    assert jnp.allclose(out, ref_f32, atol=3e-2, rtol=3e-2), (
        jnp.max(jnp.abs(out - ref_f32)))

    print("KERNEL_OK")
</pallas_src>

<mosaic_0001>
module attributes {stable_mosaic.version = 11 : i64} {
  func.func @qnet_kernel(%arg0: i32, %arg1: memref<8x8xf32, #tpu.memory_space<vmem>>, %arg2: memref<5x128x128xbf16, #tpu.memory_space<vmem>>, %arg3: memref<5x128xf32, #tpu.memory_space<vmem>>, %arg4: memref<8x4xf32, #tpu.memory_space<vmem>>) attributes {dimension_semantics = [#tpu.dimension_semantics<parallel>], iteration_bounds = array<i64: 1>, scalar_prefetch = 0 : i64, scratch_operands = 0 : i64, tpu.core_type = #tpu.core_type<tc>, window_params = [{transform_indices = @transform_0, window_bounds = array<i64: 8, 8>}, {pipeline_mode = #tpu.pipeline_mode<synchronous>, transform_indices = @transform_1, window_bounds = array<i64: 5, 128, 128>}, {pipeline_mode = #tpu.pipeline_mode<synchronous>, transform_indices = @transform_2, window_bounds = array<i64: 5, 128>}, {transform_indices = @transform_3, window_bounds = array<i64: 8, 4>}]} {
    %c0 = arith.constant 0 : index
    %c0_0 = arith.constant 0 : index
    %c0_1 = arith.constant 0 : index
    %0 = vector.load %arg2[%c0, %c0_0, %c0_1] : memref<5x128x128xbf16, #tpu.memory_space<vmem>>, vector<1x128x128xbf16>
    %1 = vector.shape_cast %0 : vector<1x128x128xbf16> to vector<128x128xbf16>
    %2 = vector.extract_strided_slice %1 {offsets = [0, 0], sizes = [8, 128], strides = [1, 1]} : vector<128x128xbf16> to vector<8x128xbf16>
    %c0_2 = arith.constant 0 : index
    %c0_3 = arith.constant 0 : index
    %3 = vector.load %arg1[%c0_2, %c0_3] : memref<8x8xf32, #tpu.memory_space<vmem>>, vector<8x8xf32>
    %4 = arith.truncf %3 : vector<8x8xf32> to vector<8x8xbf16>
    %cst = arith.constant dense<0.000000e+00> : vector<8x128xf32>
    %5 = tpu.matmul %4, %2, %cst {dimension_numbers = #tpu.dot_dimension_numbers<[1], [0], [0], [1], [0, 0, 1, 1], [], []>} : vector<8x8xbf16>, vector<8x128xbf16>, vector<8x128xf32> -> vector<8x128xf32>
    %c0_4 = arith.constant 0 : index
    %c0_5 = arith.constant 0 : index
    %6 = vector.load %arg3[%c0_4, %c0_5] : memref<5x128xf32, #tpu.memory_space<vmem>>, vector<1x128xf32>
    %7 = vector.shape_cast %6 : vector<1x128xf32> to vector<128xf32>
    %8 = vector.shape_cast %7 : vector<128xf32> to vector<1x128xf32>
    %9 = vector.broadcast %8 : vector<1x128xf32> to vector<8x128xf32>
    %10 = arith.addf %5, %9 : vector<8x128xf32>
    %cst_6 = arith.constant 0.000000e+00 : f32
    %11 = vector.broadcast %cst_6 : f32 to vector<8x128xf32>
    %12 = arith.maximumf %10, %11 : vector<8x128xf32>
    %13 = arith.truncf %12 : vector<8x128xf32> to vector<8x128xbf16>
    %c1 = arith.constant 1 : index
    %c0_7 = arith.constant 0 : index
    %c0_8 = arith.constant 0 : index
    %14 = vector.load %arg2[%c1, %c0_7, %c0_8] : memref<5x128x128xbf16, #tpu.memory_space<vmem>>, vector<1x128x128xbf16>
    %15 = vector.shape_cast %14 : vector<1x128x128xbf16> to vector<128x128xbf16>
    %cst_9 = arith.constant dense<0.000000e+00> : vector<8x128xf32>
    %16 = tpu.matmul %13, %15, %cst_9 {dimension_numbers = #tpu.dot_dimension_numbers<[1], [0], [0], [1], [0, 0, 1, 1], [], []>} : vector<8x128xbf16>, vector<128x128xbf16>, vector<8x128xf32> -> vector<8x128xf32>
    %c1_10 = arith.constant 1 : index
    %c0_11 = arith.constant 0 : index
    %17 = vector.load %arg3[%c1_10, %c0_11] : memref<5x128xf32, #tpu.memory_space<vmem>>, vector<1x128xf32>
    %18 = vector.shape_cast %17 : vector<1x128xf32> to vector<128xf32>
    %19 = vector.shape_cast %18 : vector<128xf32> to vector<1x128xf32>
    %20 = vector.broadcast %19 : vector<1x128xf32> to vector<8x128xf32>
    %21 = arith.addf %16, %20 : vector<8x128xf32>
    %cst_12 = arith.constant 0.000000e+00 : f32
    %22 = vector.broadcast %cst_12 : f32 to vector<8x128xf32>
    %23 = arith.maximumf %21, %22 : vector<8x128xf32>
    %24 = arith.truncf %23 : vector<8x128xf32> to vector<8x128xbf16>
    %c2 = arith.constant 2 : index
    %c0_13 = arith.constant 0 : index
    %c0_14 = arith.constant 0 : index
    %25 = vector.load %arg2[%c2, %c0_13, %c0_14] : memref<5x128x128xbf16, #tpu.memory_space<vmem>>, vector<1x128x128xbf16>
    %26 = vector.shape_cast %25 : vector<1x128x128xbf16> to vector<128x128xbf16>
    %cst_15 = arith.constant dense<0.000000e+00> : vector<8x128xf32>
    %27 = tpu.matmul %24, %26, %cst_15 {dimension_numbers = #tpu.dot_dimension_numbers<[1], [0], [0], [1], [0, 0, 1, 1], [], []>} : vector<8x128xbf16>, vector<128x128xbf16>, vector<8x128xf32> -> vector<8x128xf32>
    %c2_16 = arith.constant 2 : index
    %c0_17 = arith.constant 0 : index
    %28 = vector.load %arg3[%c2_16, %c0_17] : memref<5x128xf32, #tpu.memory_space<vmem>>, vector<1x128xf32>
    %29 = vector.shape_cast %28 : vector<1x128xf32> to vector<128xf32>
    %30 = vector.shape_cast %29 : vector<128xf32> to vector<1x128xf32>
    %31 = vector.broadcast %30 : vector<1x128xf32> to vector<8x128xf32>
    %32 = arith.addf %27, %31 : vector<8x128xf32>
    %cst_18 = arith.constant 0.000000e+00 : f32
    %33 = vector.broadcast %cst_18 : f32 to vector<8x128xf32>
    %34 = arith.maximumf %32, %33 : vector<8x128xf32>
    %35 = arith.truncf %34 : vector<8x128xf32> to vector<8x128xbf16>
    %c3 = arith.constant 3 : index
    %c0_19 = arith.constant 0 : index
    %c0_20 = arith.constant 0 : index
    %36 = vector.load %arg2[%c3, %c0_19, %c0_20] : memref<5x128x128xbf16, #tpu.memory_space<vmem>>, vector<1x128x128xbf16>
    %37 = vector.shape_cast %36 : vector<1x128x128xbf16> to vector<128x128xbf16>
    %cst_21 = arith.constant dense<0.000000e+00> : vector<8x128xf32>
    %38 = tpu.matmul %35, %37, %cst_21 {dimension_numbers = #tpu.dot_dimension_numbers<[1], [0], [0], [1], [0, 0, 1, 1], [], []>} : vector<8x128xbf16>, vector<128x128xbf16>, vector<8x128xf32> -> vector<8x128xf32>
    %c3_22 = arith.constant 3 : index
    %c0_23 = arith.constant 0 : index
    %39 = vector.load %arg3[%c3_22, %c0_23] : memref<5x128xf32, #tpu.memory_space<vmem>>, vector<1x128xf32>
    %40 = vector.shape_cast %39 : vector<1x128xf32> to vector<128xf32>
    %41 = vector.shape_cast %40 : vector<128xf32> to vector<1x128xf32>
    %42 = vector.broadcast %41 : vector<1x128xf32> to vector<8x128xf32>
    %43 = arith.addf %38, %42 : vector<8x128xf32>
    %cst_24 = arith.constant 0.000000e+00 : f32
    %44 = vector.broadcast %cst_24 : f32 to vector<8x128xf32>
    %45 = arith.maximumf %43, %44 : vector<8x128xf32>
    %46 = arith.truncf %45 : vector<8x128xf32> to vector<8x128xbf16>
    %c4 = arith.constant 4 : index
    %c0_25 = arith.constant 0 : index
    %c0_26 = arith.constant 0 : index
    %47 = vector.load %arg2[%c4, %c0_25, %c0_26] : memref<5x128x128xbf16, #tpu.memory_space<vmem>>, vector<1x128x128xbf16>
    %48 = vector.shape_cast %47 : vector<1x128x128xbf16> to vector<128x128xbf16>
    %cst_27 = arith.constant dense<0.000000e+00> : vector<8x128xf32>
    %49 = tpu.matmul %46, %48, %cst_27 {dimension_numbers = #tpu.dot_dimension_numbers<[1], [0], [0], [1], [0, 0, 1, 1], [], []>} : vector<8x128xbf16>, vector<128x128xbf16>, vector<8x128xf32> -> vector<8x128xf32>
    %c4_28 = arith.constant 4 : index
    %c0_29 = arith.constant 0 : index
    %50 = vector.load %arg3[%c4_28, %c0_29] : memref<5x128xf32, #tpu.memory_space<vmem>>, vector<1x128xf32>
    %51 = vector.shape_cast %50 : vector<1x128xf32> to vector<128xf32>
    %52 = vector.shape_cast %51 : vector<128xf32> to vector<1x128xf32>
    %53 = vector.broadcast %52 : vector<1x128xf32> to vector<8x128xf32>
    %54 = arith.addf %49, %53 : vector<8x128xf32>
    %55 = vector.extract_strided_slice %54 {offsets = [0, 0], sizes = [8, 4], strides = [1, 1]} : vector<8x128xf32> to vector<8x4xf32>
    %c0_30 = arith.constant 0 : index
    %c0_31 = arith.constant 0 : index
    %56 = vector.load %arg4[%c0_30, %c0_31] : memref<8x4xf32, #tpu.memory_space<vmem>>, vector<8x4xf32>
    tpu.vector_store %arg4[%c0_30, %c0_31], %55 {strides = array<i32>} : memref<8x4xf32, #tpu.memory_space<vmem>>, vector<8x4xf32>,
    return
  }
  func.func @transform_0(%arg0: i32) -> (i32, i32) {
    %c0_i32 = arith.constant 0 : i32
    %c0_i32_0 = arith.constant 0 : i32
    return %arg0, %c0_i32 : i32, i32
  }
  func.func @transform_1(%arg0: i32) -> (i32, i32, i32) {
    %c0_i32 = arith.constant 0 : i32
    %c0_i32_0 = arith.constant 0 : i32
    %c0_i32_1 = arith.constant 0 : i32
    %c0_i32_2 = arith.constant 0 : i32
    return %c0_i32, %c0_i32_0, %c0_i32_1 : i32, i32, i32
  }
  func.func @transform_2(%arg0: i32) -> (i32, i32) {
    %c0_i32 = arith.constant 0 : i32
    %c0_i32_0 = arith.constant 0 : i32
    %c0_i32_1 = arith.constant 0 : i32
    return %c0_i32, %c0_i32_0 : i32, i32
  }
  func.func @transform_3(%arg0: i32) -> (i32, i32) {
    %c0_i32 = arith.constant 0 : i32
    %c0_i32_0 = arith.constant 0 : i32
    return %arg0, %c0_i32 : i32, i32
  }
}

</mosaic_0001>

<bundles_post_ra>
// kernel: qnetwork_forward.1
= control target key start
LH: loop header
LB: loop body
LE: loop exit
PB: predicated region body
PF: predicated region fallthrough
CT: control target
= control target key end

     0   :  { %8 = vsyncpa [#allocation3], 0  ;;  %s763_s12 = smov [#allocation2]   ;;  %s864_s0 = inlined_call_operand.vmem [shape: f32[8,8], index: 0, kind: input, shape index: {}]   ;;  %s865_s1 = inlined_call_operand.hbm [shape: bf16[5,128,128], index: 1, kind: input, shape index: {}]   ;;  %s866_s2 = inlined_call_operand.vmem [shape: f32[5,128], index: 2, kind: input, shape index: {}]   ;;  %s867_s3 = inlined_call_operand.vmem [shape: f32[8,4], index: 3, kind: output, shape index: {}]  }
   0x1   :  { %s16_s13 = sshll.u32 %s763_s12, 4  ;;  %s739_s16 = scalar_lea.hbm %s865_s1, 5120  ;;  %s17_s13 = int_to_ptr.vmem [resolvable:$true] %s16_s13 }
   0x2   :  { %p740_p0 = scmp.ne.s32.totalorder %s865_s1, %s739_s16  ;;  %p743_p1 = scmp.lt.u32.totalorder %s739_s16, %s865_s1 }
   0x4   :  { %p745_p2 = pnand %p743_p1, %p740_p0 }
   0x6   :  { %748 = shalt.err (!%p745_p2)
}
   0x7   :  { %s749_s21 = scalar_lea.vmem %s17_s13, 5120  ;;  %p754_p4 = scmp.lt.s32.totalorder %s17_s13, %s17_s13 }
   0x8   :  { %p750_p3 = scmp.ne.s32.totalorder %s17_s13, %s749_s21  ;;  %p755_p5 = scmp.lt.s32.totalorder %s749_s21, %s749_s21 }
   0xa   :  { %p756_p6 = por %p755_p5, %p754_p4 }
   0xc   :  { %p757_p7 = pnand %p756_p6, %p750_p3 }
   0xe   :  { %760 = shalt.err (!%p757_p7)
}
   0xf   :  { %s764_s22 = smov 64   ;;  %s765_s23 = smov 4  }
  0x10   :  { %22 = dma.hbm_to_vmem [thread:$0]  %s865_s1, 5120, %s17_s13, [#allocation3], %s764_s22, %s764_s22, %s765_s23  }
  0x11   :  { %761 = dma.done.wait [#allocation3], 5120  }
  0x12   :  { %762 = vsyncadd [#allocation3], 4294962176  ;;  %v766_v0 = vmov 0.0   ;;  %vm767_vm0 = vmmov 0   ;;  %vm41_vm1 = vcmask 1043456   ;;  %v30_v2 = vld [vmem:[%s864_s0] sm:$0xff] }
  0x13   :  { %616 = vmatprep.subr.bf16.mxu0 %v766_v0  ;;  %618 = vmatprep.mubr.msk.bf16.mxu0 %vm767_vm0, %v766_v0  ;;  %v29_v1 = vld [vmem:[#allocation2] sm:$0xf]  ;;  %v31_v4 = vpack.c.bf16 %v30_v2, %v30_v2  ;;  %vm37_vm2 = vcmask 64512   ;;  %v708_v6 = vld [vmem:[#allocation2 + $0x48] sm:$0xff]   ;;  %v709_v7 = vld [vmem:[#allocation2 + $0x50] sm:$0xff]   ;;  %vm533_vm3 = vcmask 31744  }
  0x14   :  { %622 = vmatprep.subr.bf16.mxu1 %v766_v0  ;;  %638 = vmatprep.mubr.msk.bf16.mxu1 %vm767_vm0, %v766_v0  ;;  %v43_v3 = vsel %vm41_vm1, %v29_v1, 0  ;;  %v707_v5 = vld [vmem:[#allocation2 + $0x40] sm:$0xff]   ;;  %v710_v8 = vld [vmem:[#allocation2 + $0x58] sm:$0xff]   ;;  %v712_v10 = vld [vmem:[#allocation2 + $0x68] sm:$0xff]  }
  0x15   :  { %617 = vmatpush3.bf16.msra.mxu0 %v43_v3  ;;  %623 = vmatpush3.bf16.msra.mxu1 %v707_v5  ;;  %v711_v9 = vld [vmem:[#allocation2 + $0x60] sm:$0xff]   ;;  %v713_v11 = vld [vmem:[#allocation2 + $0x70] sm:$0xff]   ;;  %v714_v12 = vld [vmem:[#allocation2 + $0x78] sm:$0xff]  }
  0x16   :  { %642 = vmatprep.subr.bf16.mxu0 %v766_v0  ;;  %624 = vmatprep.subr.bf16.mxu1 %v766_v0  ;;  %v715_v13 = vld [vmem:[#allocation2 + $0x80] sm:$0xff]   ;;  %v716_v14 = vld [vmem:[#allocation2 + $0x88] sm:$0xff]   ;;  %v717_v15 = vld [vmem:[#allocation2 + $0x90] sm:$0xff]  }
  0x17   :  { %v718_v16 = vld [vmem:[#allocation2 + $0x98] sm:$0xff]   ;;  %v719_v17 = vld [vmem:[#allocation2 + $0xa0] sm:$0xff]   ;;  %v720_v18 = vld [vmem:[#allocation2 + $0xa8] sm:$0xff]  }
  0x18   :  { %619 = vmatmul.mubr.msk.bf16.vlgmr.msra.gmra.mrb[0].mxu0 %vm37_vm2, %v31_v4  ;;  %v540_v19 = vld [vmem:[%s866_s2] ss:$0 sm:$0xff]  ;;  %v721_v27 = vld [vmem:[#allocation2 + $0xb0] sm:$0xff]   ;;  %v723_v29 = vld [vmem:[#allocation2 + $0xc0] sm:$0xff]  }
  0x19   :  { %658 = vmatprep.mubr.msk.bf16.mxu0 %vm767_vm0, %v766_v0  ;;  %625 = vmatpush3.bf16.msra.mxu1 %v708_v6  ;;  %v722_v28 = vld [vmem:[#allocation2 + $0xb8] sm:$0xff]   ;;  %v724_v30 = vld [vmem:[#allocation2 + $0xc8] sm:$0xff]   ;;  %v725_v31 = vld [vmem:[#allocation2 + $0xd0] sm:$0xff]  }
  0x1a   :  { %626 = vmatprep.subr.bf16.mxu1 %v766_v0  ;;  %643 = vmatpush3.bf16.msra.mxu0 %v715_v13  ;;  %v726_v32 = vld [vmem:[#allocation2 + $0xd8] sm:$0xff]   ;;  %v727_v33 = vld [vmem:[#allocation2 + $0xe0] sm:$0xff]   ;;  %v728_v34 = vld [vmem:[#allocation2 + $0xe8] sm:$0xff]  }
  0x1b   :  { %644 = vmatprep.subr.bf16.mxu0 %v766_v0  ;;  %v542_v35 = vld [vmem:[%s866_s2 + $0x1] ss:$0 sm:$0xff]  ;;  %v729_v43 = vld [vmem:[#allocation2 + $0xf0] sm:$0xff]   ;;  %v731_v45 = vld [vmem:[#allocation2 + $0x100] sm:$0xff]  }
  0x1c   :  { %v730_v44 = vld [vmem:[#allocation2 + $0xf8] sm:$0xff]   ;;  %v732_v46 = vld [vmem:[#allocation2 + $0x108] sm:$0xff]   ;;  %v733_v47 = vld [vmem:[#allocation2 + $0x110] sm:$0xff]  }
  0x1d   :  { %627 = vmatpush3.bf16.msra.mxu1 %v709_v7  ;;  %v734_v48 = vld [vmem:[#allocation2 + $0x118] sm:$0xff]   ;;  %v735_v49 = vld [vmem:[#allocation2 + $0x120] sm:$0xff]   ;;  %v736_v50 = vld [vmem:[#allocation2 + $0x128] sm:$0xff]  }
  0x1e   :  { %628 = vmatprep.subr.bf16.mxu1 %v766_v0  ;;  %645 = vmatpush3.bf16.msra.mxu0 %v716_v14  ;;  %v551_v51 = vld [vmem:[%s866_s2 + $0x2] ss:$0 sm:$0xff]  ;;  %v737_v59 = vld [vmem:[#allocation2 + $0x130] sm:$0xff]   ;;  %v560_v61 = vld [vmem:[%s866_s2 + $0x3] ss:$0 sm:$0xff] }
  0x1f   :  { %646 = vmatprep.subr.bf16.mxu0 %v766_v0  ;;  %v738_v60 = vld [vmem:[#allocation2 + $0x138] sm:$0xff]  }
  0x20   :  { %v569_v6 = vld [vmem:[%s866_s2 + $0x4] ss:$0 sm:$0xff] }
  0x21   :  { %629 = vmatpush3.bf16.msra.mxu1 %v710_v8 }
  0x22   :  { %630 = vmatprep.subr.bf16.mxu1 %v766_v0  ;;  %647 = vmatpush3.bf16.msra.mxu0 %v717_v15 }
  0x23   :  { %648 = vmatprep.subr.bf16.mxu0 %v766_v0 }
  0x25   :  { %631 = vmatpush3.bf16.msra.mxu1 %v711_v9 }
  0x26   :  { %632 = vmatprep.subr.bf16.mxu1 %v766_v0  ;;  %649 = vmatpush3.bf16.msra.mxu0 %v718_v16 }
  0x27   :  { %650 = vmatprep.subr.bf16.mxu0 %v766_v0 }
  0x29   :  { %633 = vmatpush3.bf16.msra.mxu1 %v712_v10 }
  0x2a   :  { %634 = vmatprep.subr.bf16.mxu1 %v766_v0  ;;  %651 = vmatpush3.bf16.msra.mxu0 %v719_v17 }
  0x2b   :  { %652 = vmatprep.subr.bf16.mxu0 %v766_v0 }
  0x2d   :  { %635 = vmatpush3.bf16.msra.mxu1 %v713_v11 }
  0x2e   :  { %636 = vmatprep.subr.bf16.mxu1 %v766_v0  ;;  %653 = vmatpush3.bf16.msra.mxu0 %v720_v18 }
  0x2f   :  { %654 = vmatprep.subr.bf16.mxu0 %v766_v0 }
  0x31   :  { %637 = vmatpush3.bf16.msra.mxu1 %v714_v12 }
  0x32   :  { %662 = vmatprep.subr.bf16.mxu1 %v766_v0  ;;  %655 = vmatpush3.bf16.msra.mxu0 %v721_v27 }
  0x33   :  { %656 = vmatprep.subr.bf16.mxu0 %v766_v0 }
  0x36   :  { %657 = vmatpush3.bf16.msra.mxu0 %v722_v28 }
  0x37   :  { %682 = vmatprep.subr.bf16.mxu0 %v766_v0 }
  0xeb   :  { %v79_v20 = vpop.f32.mrb[0].mxu0 }
  0xec   :  { %v80_v21 = vadd.f32 %v540_v19, %v79_v20  ;;  %v620_v22 = vpop.f32.mrb[1].mxu0 }
  0xed   :  { %v82_v23 = vpop.f32.mrb[2].mxu0 }
  0xee   :  { %v85_v24 = vmax.f32 %v80_v21, 0.0  ;;  %v621_v25 = vpop.f32.mrb[3].mxu0 }
  0xf0   :  { %v86_v26 = vpack.c.bf16 %v85_v24, %v85_v24 }
  0xf2   :  { %639 = vmatmul.mubr.bf16.vlgmr.msra.gmra.mrb[0].mxu1 %v86_v26 }
  0xf3   :  { %678 = vmatprep.mubr.msk.bf16.mxu1 %vm767_vm0, %v766_v0  ;;  %663 = vmatpush3.bf16.msra.mxu1 %v723_v29 }
  0xf4   :  { %664 = vmatprep.subr.bf16.mxu1 %v766_v0 }
  0xf7   :  { %665 = vmatpush3.bf16.msra.mxu1 %v724_v30 }
  0xf8   :  { %666 = vmatprep.subr.bf16.mxu1 %v766_v0 }
  0xfb   :  { %667 = vmatpush3.bf16.msra.mxu1 %v725_v31 }
  0xfc   :  { %668 = vmatprep.subr.bf16.mxu1 %v766_v0 }
  0xff   :  { %669 = vmatpush3.bf16.msra.mxu1 %v726_v32 }
 0x100   :  { %670 = vmatprep.subr.bf16.mxu1 %v766_v0 }
 0x103   :  { %671 = vmatpush3.bf16.msra.mxu1 %v727_v33 }
 0x104   :  { %672 = vmatprep.subr.bf16.mxu1 %v766_v0 }
 0x107   :  { %673 = vmatpush3.bf16.msra.mxu1 %v728_v34 }
 0x108   :  { %674 = vmatprep.subr.bf16.mxu1 %v766_v0 }
 0x10b   :  { %675 = vmatpush3.bf16.msra.mxu1 %v729_v43 }
 0x10c   :  { %676 = vmatprep.subr.bf16.mxu1 %v766_v0 }
 0x10f   :  { %677 = vmatpush3.bf16.msra.mxu1 %v730_v44 }
 0x1c5   :  { %v191_v36 = vpop.f32.mrb[0].mxu1 }
 0x1c6   :  { %v192_v37 = vadd.f32 %v542_v35, %v191_v36  ;;  %v640_v38 = vpop.f32.mrb[1].mxu1 }
 0x1c7   :  { %v194_v39 = vpop.f32.mrb[2].mxu1 }
 0x1c8   :  { %v197_v40 = vmax.f32 %v192_v37, 0.0  ;;  %v641_v41 = vpop.f32.mrb[3].mxu1 }
 0x1ca   :  { %v198_v42 = vpack.c.bf16 %v197_v40, %v197_v40 }
 0x1cc   :  { %659 = vmatmul.mubr.bf16.vlgmr.msra.gmra.mrb[4].mxu0 %v198_v42 }
 0x1cd   :  { %698 = vmatprep.mubr.msk.bf16.mxu0 %vm767_vm0, %v766_v0  ;;  %683 = vmatpush3.bf16.msra.mxu0 %v731_v45 }
 0x1ce   :  { %684 = vmatprep.subr.bf16.mxu0 %v766_v0 }
 0x1d1   :  { %685 = vmatpush3.bf16.msra.mxu0 %v732_v46 }
 0x1d2   :  { %686 = vmatprep.subr.bf16.mxu0 %v766_v0 }
 0x1d5   :  { %687 = vmatpush3.bf16.msra.mxu0 %v733_v47 }
 0x1d6   :  { %688 = vmatprep.subr.bf16.mxu0 %v766_v0 }
 0x1d9   :  { %689 = vmatpush3.bf16.msra.mxu0 %v734_v48 }
 0x1da   :  { %690 = vmatprep.subr.bf16.mxu0 %v766_v0 }
 0x1dd   :  { %691 = vmatpush3.bf16.msra.mxu0 %v735_v49 }
 0x1de   :  { %692 = vmatprep.subr.bf16.mxu0 %v766_v0 }
 0x1e1   :  { %693 = vmatpush3.bf16.msra.mxu0 %v736_v50 }
 0x1e2   :  { %694 = vmatprep.subr.bf16.mxu0 %v766_v0 }
 0x1e5   :  { %695 = vmatpush3.bf16.msra.mxu0 %v737_v59 }
 0x1e6   :  { %696 = vmatprep.subr.bf16.mxu0 %v766_v0 }
 0x1e9   :  { %697 = vmatpush3.bf16.msra.mxu0 %v738_v60 }
 0x29f   :  { %v303_v52 = vpop.f32.mrb[4].mxu0 }
 0x2a0   :  { %v304_v53 = vadd.f32 %v551_v51, %v303_v52  ;;  %v660_v54 = vpop.f32.mrb[5].mxu0 }
 0x2a1   :  { %v306_v55 = vpop.f32.mrb[6].mxu0 }
 0x2a2   :  { %v309_v56 = vmax.f32 %v304_v53, 0.0  ;;  %v661_v57 = vpop.f32.mrb[7].mxu0 }
 0x2a4   :  { %v310_v58 = vpack.c.bf16 %v309_v56, %v309_v56 }
 0x2a6   :  { %679 = vmatmul.mubr.bf16.vlgmr.msra.gmra.mrb[4].mxu1 %v310_v58 }
 0x379   :  { %v415_v62 = vpop.f32.mrb[4].mxu1 }
 0x37a   :  { %v416_v63 = vadd.f32 %v560_v61, %v415_v62  ;;  %v680_v1 = vpop.f32.mrb[5].mxu1 }
 0x37b   :  { %v418_v2 = vpop.f32.mrb[6].mxu1 }
 0x37c   :  { %v421_v3 = vmax.f32 %v416_v63, 0.0  ;;  %v681_v4 = vpop.f32.mrb[7].mxu1 }
 0x37e   :  { %v422_v5 = vpack.c.bf16 %v421_v3, %v421_v3 }
 0x380   :  { %699 = vmatmul.mubr.bf16.vlgmr.msra.gmra.mrb[8].mxu0 %v422_v5 }
 0x453   :  { %v527_v7 = vpop.f32.mrb[8].mxu0 }
 0x454   :  { %v528_v0 = vadd.f32 %v569_v6, %v527_v7  ;;  %v700_v8 = vpop.f32.mrb[9].mxu0 }
 0x455   :  { %v530_v9 = vpop.f32.mrb[10].mxu0 }
 0x456   :  { %534 = vst.msk [vmem:[%s867_s3] sm:$0xff] %vm533_vm3, %v528_v0  ;;  %v701_v10 = vpop.f32.mrb[11].mxu0 }
 0x457   :  { %539 = vsyncpa [#allocation3], 1 }

</bundles_post_ra>
